<compile_context>
chip_gen: v7x
topology: tpu7x:2x2x1
jax: 0.10.0
libtpu: 0.0.40
codegen_flags: <defaults>
</compile_context>

<pallas_src>
import functools

import jax
import jax.numpy as jnp
from jax.experimental import pallas as pl
from jax.experimental.pallas import tpu as pltpu


def _adapter_residual_kernel(x_ref, w1_ref, w2_ref, o_ref):
    """Fused: out = x + relu(relu(x @ W1) @ W2).

    x_ref : (tm, D)  VMEM tile of flattened image_embeds rows (I/O dtype)
    w1_ref: (D, H)   adapter down-projection, bf16 (H = D // reduction)
    w2_ref: (H, D)   adapter up-projection, bf16
    o_ref : (tm, D)  output tile (I/O dtype)
    """
    x = x_ref[...]
    # bf16 matmul inputs (native MXU path on v6e/v7x), f32 accumulation.
    h = jnp.dot(x.astype(jnp.bfloat16), w1_ref[...],
                preferred_element_type=jnp.float32)
    h = jnp.maximum(h, 0.0)                      # ReLU (inplace in torch)
    y = jnp.dot(h.astype(jnp.bfloat16), w2_ref[...],
                preferred_element_type=jnp.float32)
    y = jnp.maximum(y, 0.0)                      # ReLU
    # Residual add kept in f32; cast only on the final store.
    o_ref[...] = (x.astype(jnp.float32) + y).astype(o_ref.dtype)


def _round_up(x, m):
    return -(-x // m) * m


@functools.partial(jax.jit, static_argnames=("tile_rows",))
def adapter_blip_residual(image_embeds, w1, w2, *, tile_rows=512):
    """image_embeds: (B, N, D); w1: (D, H); w2: (H, D).

    Returns image_embeds + Adapter(image_embeds), matching
    `image_embeds = image_embeds + self.vision_adapter(image_embeds)`.
    """
    B, N, D = image_embeds.shape
    H = w1.shape[1]
    rows = B * N

    # Clamp the row tile for tiny inputs; keep it a multiple of 8 (sublane) so
    # the BlockSpec satisfies the (8, 128) tiling constraint.
    tile = min(int(tile_rows), _round_up(rows, 8))
    tile = _round_up(tile, 8)
    rows_pad = _round_up(rows, tile)           # pad B*N (e.g. B*577) to tile

    x2d = image_embeds.reshape(rows, D)
    if rows_pad != rows:
        # Zero rows are a no-op through the adapter (relu(0@W)=0) and are
        # sliced off below.
        x2d = jnp.pad(x2d, ((0, rows_pad - rows), (0, 0)))

    # bf16 weights: halves weight HBM/VMEM footprint; weights stay resident
    # across the whole grid (constant index_map).
    w1b = w1.astype(jnp.bfloat16)
    w2b = w2.astype(jnp.bfloat16)

    itemsize = x2d.dtype.itemsize
    cost = pl.CostEstimate(
        flops=4 * rows_pad * D * H,            # two matmuls
        transcendentals=0,
        bytes_accessed=2 * rows_pad * D * itemsize + 2 * (D * H + H * D),
    )

    grid = rows_pad // tile

    out2d = pl.pallas_call(
        _adapter_residual_kernel,
        out_shape=jax.ShapeDtypeStruct((rows_pad, D), image_embeds.dtype),
        grid_spec=pltpu.PrefetchScalarGridSpec(
            num_scalar_prefetch=0,
            grid=(grid,),
            in_specs=[
                pl.BlockSpec((tile, D), lambda i: (i, 0)),  # x rows
                pl.BlockSpec((D, H), lambda i: (0, 0)),     # W1 (resident)
                pl.BlockSpec((H, D), lambda i: (0, 0)),     # W2 (resident)
            ],
            out_specs=pl.BlockSpec((tile, D), lambda i: (i, 0)),
        ),
        compiler_params=pltpu.CompilerParams(
            dimension_semantics=("parallel",),
            vmem_limit_bytes=48 * 1024 * 1024,
        ),
        cost_estimate=cost,
        # Write the residual result in place over the flattened embeddings.
        input_output_aliases={0: 0},
    )(x2d, w1b, w2b)

    return out2d[:rows].reshape(B, N, D)


def _reference(image_embeds, w1, w2):
    h = jnp.maximum(image_embeds @ w1, 0.0)
    y = jnp.maximum(h @ w2, 0.0)
    return image_embeds + y


if __name__ == "__main__":
    # Small synthetic shapes consistent with the module's forward:
    #   image_embeds = visual_encoder(image) -> (B, N, vision_width)
    D = 32               # vision_width (768 in real BLIP-base)
    reduction = 4
    Hd = D // reduction  # adapter bottleneck

    key = jax.random.PRNGKey(0)
    k_x, k_w1, k_w2 = jax.random.split(key, 3)

    # Adapter weights (nn.Linear stores (out, in); we use (in, out) for x @ W).
    w1 = jax.random.normal(k_w1, (D, Hd), dtype=jnp.float32) * (1.0 / jnp.sqrt(D))
    w2 = jax.random.normal(k_w2, (Hd, D), dtype=jnp.float32) * (1.0 / jnp.sqrt(Hd))

    ok = True

    # Case 1: tiny, tile-divisible shape.
    B, N = 2, 8
    x = jax.random.normal(k_x, (B, N, D), dtype=jnp.float32)
    out = jax.block_until_ready(adapter_blip_residual(x, w1, w2))
    ref = _reference(x, w1, w2)
    assert out.shape == (B, N, D)
    ok &= bool(jnp.allclose(out, ref, atol=3e-2, rtol=3e-2))

    # Case 2: realistic token count (577 = CLS + 576 patches) — exercises the
    # pad-to-tile path with the large default tile.
    B2, N2 = 2, 577
    x2 = jax.random.normal(k_x, (B2, N2, D), dtype=jnp.float32)
    out2 = jax.block_until_ready(adapter_blip_residual(x2, w1, w2))
    ref2 = _reference(x2, w1, w2)
    assert out2.shape == (B2, N2, D)
    ok &= bool(jnp.allclose(out2, ref2, atol=3e-2, rtol=3e-2))

    assert ok, "mismatch vs reference"
    print("KERNEL_OK")
</pallas_src>

<mosaic_0001>
module attributes {stable_mosaic.version = 11 : i64} {
  func.func @_adapter_residual_kernel(%arg0: i32, %arg1: memref<16x32xf32, #tpu.memory_space<vmem>>, %arg2: memref<32x8xbf16, #tpu.memory_space<vmem>>, %arg3: memref<8x32xbf16, #tpu.memory_space<vmem>>, %arg4: memref<16x32xf32, #tpu.memory_space<vmem>>) attributes {dimension_semantics = [#tpu.dimension_semantics<parallel>], iteration_bounds = array<i64: 1>, scalar_prefetch = 0 : i64, scratch_operands = 0 : i64, tpu.core_type = #tpu.core_type<tc>, window_params = [{transform_indices = @transform_0, window_bounds = array<i64: 16, 32>}, {pipeline_mode = #tpu.pipeline_mode<synchronous>, transform_indices = @transform_1, window_bounds = array<i64: 32, 8>}, {pipeline_mode = #tpu.pipeline_mode<synchronous>, transform_indices = @transform_2, window_bounds = array<i64: 8, 32>}, {transform_indices = @transform_3, window_bounds = array<i64: 16, 32>}]} {
    %c0 = arith.constant 0 : index
    %c0_0 = arith.constant 0 : index
    %0 = vector.load %arg1[%c0, %c0_0] : memref<16x32xf32, #tpu.memory_space<vmem>>, vector<16x32xf32>
    %1 = arith.truncf %0 : vector<16x32xf32> to vector<16x32xbf16>
    %c0_1 = arith.constant 0 : index
    %c0_2 = arith.constant 0 : index
    %2 = vector.load %arg2[%c0_1, %c0_2] : memref<32x8xbf16, #tpu.memory_space<vmem>>, vector<32x8xbf16>
    %cst = arith.constant dense<0.000000e+00> : vector<16x8xf32>
    %3 = tpu.matmul %1, %2, %cst {dimension_numbers = #tpu.dot_dimension_numbers<[1], [0], [0], [1], [0, 0, 1, 1], [], []>} : vector<16x32xbf16>, vector<32x8xbf16>, vector<16x8xf32> -> vector<16x8xf32>
    %cst_3 = arith.constant 0.000000e+00 : f32
    %4 = vector.broadcast %cst_3 : f32 to vector<16x8xf32>
    %5 = arith.maximumf %3, %4 : vector<16x8xf32>
    %6 = arith.truncf %5 : vector<16x8xf32> to vector<16x8xbf16>
    %c0_4 = arith.constant 0 : index
    %c0_5 = arith.constant 0 : index
    %7 = vector.load %arg3[%c0_4, %c0_5] : memref<8x32xbf16, #tpu.memory_space<vmem>>, vector<8x32xbf16>
    %cst_6 = arith.constant dense<0.000000e+00> : vector<16x32xf32>
    %8 = tpu.matmul %6, %7, %cst_6 {dimension_numbers = #tpu.dot_dimension_numbers<[1], [0], [0], [1], [0, 0, 1, 1], [], []>} : vector<16x8xbf16>, vector<8x32xbf16>, vector<16x32xf32> -> vector<16x32xf32>
    %cst_7 = arith.constant 0.000000e+00 : f32
    %9 = vector.broadcast %cst_7 : f32 to vector<16x32xf32>
    %10 = arith.maximumf %8, %9 : vector<16x32xf32>
    %11 = arith.addf %0, %10 : vector<16x32xf32>
    %c0_8 = arith.constant 0 : index
    %c0_9 = arith.constant 0 : index
    %12 = vector.load %arg4[%c0_8, %c0_9] : memref<16x32xf32, #tpu.memory_space<vmem>>, vector<16x32xf32>
    tpu.vector_store %arg4[%c0_8, %c0_9], %11 {strides = array<i32>} : memref<16x32xf32, #tpu.memory_space<vmem>>, vector<16x32xf32>,
    return
  }
  func.func @transform_0(%arg0: i32) -> (i32, i32) {
    %c0_i32 = arith.constant 0 : i32
    %c0_i32_0 = arith.constant 0 : i32
    return %arg0, %c0_i32 : i32, i32
  }
  func.func @transform_1(%arg0: i32) -> (i32, i32) {
    %c0_i32 = arith.constant 0 : i32
    %c0_i32_0 = arith.constant 0 : i32
    %c0_i32_1 = arith.constant 0 : i32
    return %c0_i32, %c0_i32_0 : i32, i32
  }
  func.func @transform_2(%arg0: i32) -> (i32, i32) {
    %c0_i32 = arith.constant 0 : i32
    %c0_i32_0 = arith.constant 0 : i32
    %c0_i32_1 = arith.constant 0 : i32
    return %c0_i32, %c0_i32_0 : i32, i32
  }
  func.func @transform_3(%arg0: i32) -> (i32, i32) {
    %c0_i32 = arith.constant 0 : i32
    %c0_i32_0 = arith.constant 0 : i32
    return %arg0, %c0_i32 : i32, i32
  }
}

</mosaic_0001>

<bundles_post_ra>
// kernel: adapter_blip_residual.1
= control target key start
LH: loop header
LB: loop body
LE: loop exit
PB: predicated region body
PF: predicated region fallthrough
CT: control target
= control target key end

     0   :  { %v169_v0 = vmov 0.0   ;;  %vm170_vm0 = vmmov 0   ;;  %vm34_vm1 = vcmask 261120   ;;  %vm87_vm2 = vcmask 1043456   ;;  %s215_s1 = inlined_call_operand.vmem [shape: bf16[32,8], index: 1, kind: input, shape index: {}]   ;;  %s216_s0 = inlined_call_operand.vmem [shape: f32[16,32], index: 0, kind: input, shape index: {}, may-alias: {0,3}]   ;;  %s217_s2 = inlined_call_operand.vmem [shape: bf16[8,32], index: 2, kind: input, shape index: {}]   ;;  %s218_s3 = inlined_call_operand.vmem [shape: f32[16,32], index: 3, kind: output, shape index: {}, may-alias: {0,3}]  }
   0x1   :  { %151 = vmatprep.subr.bf16.mxu0 %v169_v0  ;;  %v167_v1 = vld [vmem:[%s215_s1] sm:$0xff]   ;;  %155 = vmatprep.mubr.msk.bf16.mxu0 %vm170_vm0, %v169_v0  ;;  %v168_v2 = vld [vmem:[%s215_s1 + $0x8] sm:$0xff]   ;;  %vm83_vm3 = vcmask 64512  }
   0x2   :  { %159 = vmatprep.subr.bf16.mxu1 %v169_v0  ;;  %161 = vmatprep.mubr.msk.bf16.mxu1 %vm170_vm0, %v169_v0  ;;  %v15_v3 = vld [vmem:[%s216_s0] sm:$0xff]  ;;  %v16_v4 = vld [vmem:[%s216_s0 + $0x8] sm:$0xff] }
   0x3   :  { %152 = vmatpush3.bf16.msra.mxu0 %v167_v1  ;;  %v17_v5 = vpack.c.bf16 %v16_v4, %v15_v3  ;;  %v82_v6 = vld [vmem:[%s217_s2] sm:$0xf] }
   0x4   :  { %153 = vmatprep.subr.bf16.mxu0 %v169_v0  ;;  %v89_v7 = vsel %vm87_vm2, %v82_v6, 0 }
   0x5   :  { %160 = vmatpush3.bf16.msra.mxu1 %v89_v7 }
   0x7   :  { %154 = vmatpush3.bf16.msra.mxu0 %v168_v2 }
   0xa   :  { %156 = vmatmul.mubr.msk.bf16.vlgmr.msra.gmra.mrb[0].mxu0 %vm34_vm1, %v17_v5 }
  0xdd   :  { %v72_v8 = vpop.f32.mrb[0].mxu0 }
  0xde   :  { %v157_v9 = vpop.f32.mrb[1].mxu0  ;;  %v79_v11 = vmax.f32 %v72_v8, 0.0 }
  0xdf   :  { %v75_v10 = vpop.f32.mrb[2].mxu0 }
  0xe0   :  { %v80_v12 = vmax.f32 %v75_v10, 0.0  ;;  %v158_v13 = vpop.f32.mrb[3].mxu0 }
  0xe2   :  { %v81_v14 = vpack.c.bf16 %v80_v12, %v79_v11 }
  0xe4   :  { %162 = vmatmul.mubr.msk.bf16.vlgmr.msra.gmra.mrb[0].mxu1 %vm83_vm3, %v81_v14 }
 0x1b7   :  { %v125_v15 = vpop.f32.mrb[0].mxu1 }
 0x1b8   :  { %v132_v16 = vmax.f32 %v125_v15, 0.0  ;;  %v163_v17 = vpop.f32.mrb[1].mxu1 }
 0x1b9   :  { %v128_v18 = vpop.f32.mrb[2].mxu1 }
 0x1ba   :  { %v134_v19 = vadd.f32 %v132_v16, %v15_v3  ;;  %v133_v20 = vmax.f32 %v128_v18, 0.0  ;;  %v164_v21 = vpop.f32.mrb[3].mxu1 }
 0x1bc   :  { %136 = vst.msk [vmem:[%s218_s3] sm:$0xff] %vm34_vm1, %v134_v19  ;;  %v135_v22 = vadd.f32 %v133_v20, %v16_v4 }
 0x1be   :  { %137 = vst.msk [vmem:[%s218_s3 + $0x8] sm:$0xff] %vm34_vm1, %v135_v22 }

</bundles_post_ra>
